<compile_context>
chip_gen: v5e
topology: v5e:2x2
jax: 0.10.0
libtpu: 0.0.40
codegen_flags: <defaults>
</compile_context>

<pallas_src>
import functools
import math

import jax
import jax.numpy as jnp
from jax.experimental import pallas as pl
from jax.experimental.pallas import tpu as pltpu


# Soft per-stage VMEM budget (all input tiles + the output tile). The Pallas
# pipeline double-buffers, so peak ~= 2x this; 8 MiB keeps us inside the
# default scoped VMEM limit on v5e/v6e/v7x without raising vmem_limit_bytes.
_VMEM_TILE_BUDGET = 8 * 1024 * 1024
# Row tiles are multiples of 32 -> valid sublane multiples for f32/bf16/int8.
_ROW_TILE_LADDER = (1024, 512, 256, 128, 64, 32)
# Column tiles are multiples of 128 (lane width).
_COL_TILE_LADDER = (4096, 2048, 1024, 512, 256, 128)


def _concat_copy_kernel(sizes, axis, *refs):
    """Copy each input block into its statically-known slice of the output block.

    The dtype cast (if any) is fused into the copy so mixed-dtype concat does
    not pay a separate HBM convert pass.
    """
    out_ref = refs[-1]
    in_refs = refs[:-1]
    ndim = len(out_ref.shape)
    offset = 0
    for ref, size in zip(in_refs, sizes):
        idx = [slice(None)] * ndim
        idx[axis] = pl.ds(offset, size)  # static offset & size
        out_ref[tuple(idx)] = ref[...].astype(out_ref.dtype)
        offset += size


def _pick_tile(full, per_unit_bytes, ladder):
    """Largest tile (rows or lanes) whose double-buffered footprint fits budget."""
    max_units = max(_VMEM_TILE_BUDGET // (2 * max(per_unit_bytes, 1)), 1)
    if full <= max_units:
        return full  # full extent is always a legal block dim
    for cand in ladder:
        if cand <= max_units:
            return cand
    return ladder[-1]


def concat(xs, dim=-1):
    """Pallas equivalent of torch.cat(xs, dim=dim)."""
    xs = list(xs)
    assert len(xs) >= 1
    ndim = xs[0].ndim
    axis = dim % ndim
    out_dtype = jnp.result_type(*[x.dtype for x in xs])

    total = sum(int(x.shape[axis]) for x in xs)
    full_shape = list(xs[0].shape)
    full_shape[axis] = total
    full_shape = tuple(full_shape)

    # Drop zero-width inputs (legal in torch.cat).
    xs = [x for x in xs if x.shape[axis] != 0]
    if not xs:
        return jnp.zeros(full_shape, out_dtype)
    if len(xs) == 1:
        return xs[0].astype(out_dtype).reshape(full_shape)

    sizes = [int(x.shape[axis]) for x in xs]
    outer = math.prod(full_shape[:axis])
    inner = math.prod(full_shape[axis + 1:])
    itemsizes = [x.dtype.itemsize for x in xs]
    out_itemsize = jnp.dtype(out_dtype).itemsize

    if inner == 1:
        # Concat along the true minor (lane) axis: 2D (outer, size_i),
        # grid tiles the collapsed leading dim.
        xs2 = [x.reshape(outer, s) for x, s in zip(xs, sizes)]
        out2_shape = (outer, total)
        per_row = sum(s * it for s, it in zip(sizes, itemsizes)) + total * out_itemsize
        tr = _pick_tile(outer, per_row, _ROW_TILE_LADDER)
        grid = (pl.cdiv(outer, tr),)
        in_specs = [pl.BlockSpec((tr, s), lambda i: (i, 0)) for s in sizes]
        out_spec = pl.BlockSpec((tr, total), lambda i: (i, 0))
        block_axis = 1
    elif outer == 1:
        # Leading-axis concat: 2D (size_i, inner), grid tiles the lane dim,
        # concat slices hit the sublane dim -> lane-dense stores.
        xs2 = [x.reshape(s, inner) for x, s in zip(xs, sizes)]
        out2_shape = (total, inner)
        per_col = sum(s * it for s, it in zip(sizes, itemsizes)) + total * out_itemsize
        tc = _pick_tile(inner, per_col, _COL_TILE_LADDER)
        grid = (pl.cdiv(inner, tc),)
        in_specs = [pl.BlockSpec((s, tc), lambda j: (0, j)) for s in sizes]
        out_spec = pl.BlockSpec((total, tc), lambda j: (0, j))
        block_axis = 0
    else:
        # General case: 3D (outer, size_i, inner); concat axis is second-minor,
        # the minor (lane) dim stays full-width -> unmasked lane-wide stores.
        xs2 = [x.reshape(outer, s, inner) for x, s in zip(xs, sizes)]
        out2_shape = (outer, total, inner)
        per_row = (sum(s * it for s, it in zip(sizes, itemsizes))
                   + total * out_itemsize) * inner
        tr = _pick_tile(outer, per_row, _ROW_TILE_LADDER)
        grid = (pl.cdiv(outer, tr),)
        in_specs = [pl.BlockSpec((tr, s, inner), lambda i: (i, 0, 0)) for s in sizes]
        out_spec = pl.BlockSpec((tr, total, inner), lambda i: (i, 0, 0))
        block_axis = 1

    in_bytes = sum(x.size * it for x, it in zip(xs, itemsizes))
    out_bytes = math.prod(full_shape) * out_itemsize
    cost = pl.CostEstimate(flops=0, transcendentals=0,
                           bytes_accessed=in_bytes + out_bytes)

    kernel = functools.partial(_concat_copy_kernel, tuple(sizes), block_axis)

    out2 = pl.pallas_call(
        kernel,
        out_shape=jax.ShapeDtypeStruct(out2_shape, out_dtype),
        grid=grid,
        in_specs=in_specs,
        out_specs=out_spec,
        compiler_params=pltpu.CompilerParams(
            dimension_semantics=("parallel",)),  # megacore sharding on v7x
        cost_estimate=cost,
    )(*xs2)
    return out2.reshape(full_shape)


class Concat:
    """Mirror of the PyTorch Concat module."""

    def __init__(self, dim=-1):
        self.dim = dim

    def __call__(self, xs):
        return concat(xs, dim=self.dim)


if __name__ == "__main__":
    key = jax.random.PRNGKey(0)
    k1, k2, k3 = jax.random.split(key, 3)

    # Small NCHW-ish inputs differing only along the concat axis (last dim).
    x1 = jax.random.normal(k1, (2, 4, 16, 16), dtype=jnp.float32)
    x2 = jax.random.normal(k2, (2, 4, 16, 8), dtype=jnp.float32)
    x3 = jax.random.normal(k3, (2, 4, 16, 32), dtype=jnp.float32)

    mod = Concat(dim=-1)
    out = jax.block_until_ready(mod([x1, x2, x3]))
    ref = jnp.concatenate([x1, x2, x3], axis=-1)
    assert out.shape == ref.shape, (out.shape, ref.shape)
    assert out.dtype == ref.dtype, (out.dtype, ref.dtype)
    assert jnp.allclose(out, ref), "mismatch vs jnp.concatenate (dim=-1)"

    # Channel concat (dim=1): exercises the 3D lane-dense path.
    out_c = jax.block_until_ready(Concat(dim=1)([x1, x1]))
    assert jnp.allclose(out_c, jnp.concatenate([x1, x1], axis=1)), "dim=1 mismatch"

    # Batch concat (dim=0): exercises the leading-axis / column-tiled path.
    y1 = jax.random.normal(k1, (3, 4, 16, 16), dtype=jnp.float32)
    out_0 = jax.block_until_ready(Concat(dim=0)([x1, y1]))
    assert jnp.allclose(out_0, jnp.concatenate([x1, y1], axis=0)), "dim=0 mismatch"

    # Mixed dtypes: cast is fused inside the kernel copy.
    xb = x2.astype(jnp.bfloat16)
    out_m = jax.block_until_ready(Concat(dim=-1)([x1, xb]))
    ref_m = jnp.concatenate([x1, xb.astype(jnp.float32)], axis=-1)
    assert out_m.dtype == jnp.float32
    assert jnp.allclose(out_m, ref_m), "mixed-dtype mismatch"

    print("KERNEL_OK")
</pallas_src>

<mosaic_0001>
module attributes {stable_mosaic.version = 11 : i64} {
  func.func @_concat_copy_kernel(%arg0: i32, %arg1: memref<128x16xf32, #tpu.memory_space<vmem>>, %arg2: memref<128x8xf32, #tpu.memory_space<vmem>>, %arg3: memref<128x32xf32, #tpu.memory_space<vmem>>, %arg4: memref<128x56xf32, #tpu.memory_space<vmem>>) attributes {dimension_semantics = [#tpu.dimension_semantics<parallel>], iteration_bounds = array<i64: 1>, scalar_prefetch = 0 : i64, scratch_operands = 0 : i64, tpu.core_type = #tpu.core_type<tc>, window_params = [{transform_indices = @transform_0, window_bounds = array<i64: 128, 16>}, {transform_indices = @transform_1, window_bounds = array<i64: 128, 8>}, {transform_indices = @transform_2, window_bounds = array<i64: 128, 32>}, {transform_indices = @transform_3, window_bounds = array<i64: 128, 56>}]} {
    %c0 = arith.constant 0 : index
    %c0_0 = arith.constant 0 : index
    %0 = vector.load %arg1[%c0, %c0_0] : memref<128x16xf32, #tpu.memory_space<vmem>>, vector<128x16xf32>
    %c0_1 = arith.constant 0 : index
    %c0_2 = arith.constant 0 : index
    %1 = vector.load %arg4[%c0_1, %c0_2] : memref<128x56xf32, #tpu.memory_space<vmem>>, vector<128x16xf32>
    tpu.vector_store %arg4[%c0_1, %c0_2], %0 {strides = array<i32>} : memref<128x56xf32, #tpu.memory_space<vmem>>, vector<128x16xf32>,
    %c0_3 = arith.constant 0 : index
    %c0_4 = arith.constant 0 : index
    %2 = vector.load %arg2[%c0_3, %c0_4] : memref<128x8xf32, #tpu.memory_space<vmem>>, vector<128x8xf32>
    %c0_5 = arith.constant 0 : index
    %c16 = arith.constant 16 : index
    %3 = vector.load %arg4[%c0_5, %c16] : memref<128x56xf32, #tpu.memory_space<vmem>>, vector<128x8xf32>
    tpu.vector_store %arg4[%c0_5, %c16], %2 {strides = array<i32>} : memref<128x56xf32, #tpu.memory_space<vmem>>, vector<128x8xf32>,
    %c0_6 = arith.constant 0 : index
    %c0_7 = arith.constant 0 : index
    %4 = vector.load %arg3[%c0_6, %c0_7] : memref<128x32xf32, #tpu.memory_space<vmem>>, vector<128x32xf32>
    %c0_8 = arith.constant 0 : index
    %c24 = arith.constant 24 : index
    %5 = vector.load %arg4[%c0_8, %c24] : memref<128x56xf32, #tpu.memory_space<vmem>>, vector<128x32xf32>
    tpu.vector_store %arg4[%c0_8, %c24], %4 {strides = array<i32>} : memref<128x56xf32, #tpu.memory_space<vmem>>, vector<128x32xf32>,
    return
  }
  func.func @transform_0(%arg0: i32) -> (i32, i32) {
    %c0_i32 = arith.constant 0 : i32
    %c0_i32_0 = arith.constant 0 : i32
    return %arg0, %c0_i32 : i32, i32
  }
  func.func @transform_1(%arg0: i32) -> (i32, i32) {
    %c0_i32 = arith.constant 0 : i32
    %c0_i32_0 = arith.constant 0 : i32
    return %arg0, %c0_i32 : i32, i32
  }
  func.func @transform_2(%arg0: i32) -> (i32, i32) {
    %c0_i32 = arith.constant 0 : i32
    %c0_i32_0 = arith.constant 0 : i32
    return %arg0, %c0_i32 : i32, i32
  }
  func.func @transform_3(%arg0: i32) -> (i32, i32) {
    %c0_i32 = arith.constant 0 : i32
    %c0_i32_0 = arith.constant 0 : i32
    return %arg0, %c0_i32 : i32, i32
  }
}

</mosaic_0001>

<bundles_post_ra>
// kernel: tpu_custom_call.1
= control target key start
LH: loop header
LB: loop body
LE: loop exit
PB: predicated region body
PF: predicated region fallthrough
CT: control target
= control target key end

     0   :  { %s247_s16 = smov 16   ;;  %s248_s21 = smov 24   ;;  %vm30_vm0 = vcmask 130048   ;;  %vm127_vm1 = vcmask 195712   ;;  %vm224_vm2 = vcmask 457920   ;;  %s637_s1 = inlined_call_operand.vmem [shape: f32[128,8], index: 1, kind: input, shape index: {}]   ;;  %s638_s2 = inlined_call_operand.vmem [shape: f32[128,32], index: 2, kind: input, shape index: {}]   ;;  %s639_s0 = inlined_call_operand.vmem [shape: f32[128,16], index: 0, kind: input, shape index: {}]   ;;  %s640_s3 = inlined_call_operand.vmem [shape: f32[128,56], index: 3, kind: output, shape index: {}]  }
   0x1   :  { %v49_v0 = vld [vmem:[%s637_s1 + $0x10] sm:$0xff]  ;;  %v47_v1 = vld [vmem:[%s637_s1] sm:$0xff]  ;;  %v50_v3 = vld [vmem:[%s637_s1 + $0x18] sm:$0xff] }
   0x2   :  { %83 = vrot.lane.b32.xlu1 %v49_v0, %s247_s16  ;;  %79 = vrot.lane.b32.xlu0 %v47_v1, %s247_s16  ;;  %v51_v2 = vld [vmem:[%s637_s1 + $0x20] sm:$0xff]  ;;  %v48_v4 = vld [vmem:[%s637_s1 + $0x8] sm:$0xff] }
   0x3   :  { %87 = vrot.lane.b32.xlu2 %v51_v2, %s247_s16  ;;  %v52_v5 = vld [vmem:[%s637_s1 + $0x28] sm:$0xff]  ;;  %v54_v6 = vld [vmem:[%s637_s1 + $0x38] sm:$0xff]  ;;  %v53_v7 = vld [vmem:[%s637_s1 + $0x30] sm:$0xff] }
   0x4   :  { %v55_v8 = vld [vmem:[%s637_s1 + $0x40] sm:$0xff]  ;;  %v57_v9 = vld [vmem:[%s637_s1 + $0x50] sm:$0xff]  ;;  %v56_v10 = vld [vmem:[%s637_s1 + $0x48] sm:$0xff] }
   0x5   :  { %v58_v11 = vld [vmem:[%s637_s1 + $0x58] sm:$0xff]  ;;  %v60_v12 = vld [vmem:[%s637_s1 + $0x68] sm:$0xff]  ;;  %v59_v13 = vld [vmem:[%s637_s1 + $0x60] sm:$0xff] }
   0x6   :  { %v61_v14 = vld [vmem:[%s637_s1 + $0x70] sm:$0xff]  ;;  %v144_v15 = vld [vmem:[%s638_s2] sm:$0xff]  ;;  %v62_v16 = vld [vmem:[%s637_s1 + $0x78] sm:$0xff] }
   0x7   :  { %v145_v17 = vld [vmem:[%s638_s2 + $0x8] sm:$0xff]  ;;  %v147_v18 = vld [vmem:[%s638_s2 + $0x18] sm:$0xff]  ;;  %v146_v19 = vld [vmem:[%s638_s2 + $0x10] sm:$0xff] }
   0x8   :  { %v148_v20 = vld [vmem:[%s638_s2 + $0x20] sm:$0xff]  ;;  %v150_v21 = vld [vmem:[%s638_s2 + $0x30] sm:$0xff]  ;;  %v149_v22 = vld [vmem:[%s638_s2 + $0x28] sm:$0xff] }
   0x9   :  { %v151_v23 = vld [vmem:[%s638_s2 + $0x38] sm:$0xff]  ;;  %v153_v24 = vld [vmem:[%s638_s2 + $0x48] sm:$0xff]  ;;  %v152_v25 = vld [vmem:[%s638_s2 + $0x40] sm:$0xff] }
   0xa   :  { %85 = vrot.lane.b32.xlu1 %v50_v3, %s247_s16  ;;  %81 = vrot.lane.b32.xlu0 %v48_v4, %s247_s16  ;;  %v154_v26 = vld [vmem:[%s638_s2 + $0x50] sm:$0xff]  ;;  %v156_v27 = vld [vmem:[%s638_s2 + $0x60] sm:$0xff] }
   0xb   :  { %89 = vrot.lane.b32.xlu2 %v52_v5, %s247_s16  ;;  %v155_v28 = vld [vmem:[%s638_s2 + $0x58] sm:$0xff]  ;;  %v157_v29 = vld [vmem:[%s638_s2 + $0x68] sm:$0xff]  ;;  %v158_v31 = vld [vmem:[%s638_s2 + $0x70] sm:$0xff] }
   0xc   :  { %v159_v30 = vld [vmem:[%s638_s2 + $0x78] sm:$0xff]  ;;  %v16_v32 = vld [vmem:[%s639_s0 + $0x10] sm:$0xff]  ;;  %v14_v33 = vld [vmem:[%s639_s0] sm:$0xff] }
   0xd   :  { %33 = vst.msk [vmem:[%s640_s3 + $0x10] sm:$0xff] %vm30_vm0, %v16_v32  ;;  %v18_v34 = vld [vmem:[%s639_s0 + $0x20] sm:$0xff]  ;;  %v17_v35 = vld [vmem:[%s639_s0 + $0x18] sm:$0xff]  ;;  %v15_v36 = vld [vmem:[%s639_s0 + $0x8] sm:$0xff] }
   0xe   :  { %31 = vst.msk [vmem:[%s640_s3] sm:$0xff] %vm30_vm0, %v14_v33  ;;  %v19_v37 = vld [vmem:[%s639_s0 + $0x28] sm:$0xff]  ;;  %v21_v39 = vld [vmem:[%s639_s0 + $0x38] sm:$0xff]  ;;  %v20_v40 = vld [vmem:[%s639_s0 + $0x30] sm:$0xff] }
   0xf   :  { %35 = vst.msk [vmem:[%s640_s3 + $0x20] sm:$0xff] %vm30_vm0, %v18_v34  ;;  %v22_v41 = vld [vmem:[%s639_s0 + $0x40] sm:$0xff]  ;;  %v24_v43 = vld [vmem:[%s639_s0 + $0x50] sm:$0xff]  ;;  %v23_v44 = vld [vmem:[%s639_s0 + $0x48] sm:$0xff] }
  0x10   :  { %34 = vst.msk [vmem:[%s640_s3 + $0x18] sm:$0xff] %vm30_vm0, %v17_v35  ;;  %v25_v45 = vld [vmem:[%s639_s0 + $0x58] sm:$0xff]  ;;  %v27_v49 = vld [vmem:[%s639_s0 + $0x68] sm:$0xff]  ;;  %v26_v50 = vld [vmem:[%s639_s0 + $0x60] sm:$0xff] }
  0x11   :  { %32 = vst.msk [vmem:[%s640_s3 + $0x8] sm:$0xff] %vm30_vm0, %v15_v36  ;;  %v28_v52 = vld [vmem:[%s639_s0 + $0x70] sm:$0xff]  ;;  %v29_v55 = vld [vmem:[%s639_s0 + $0x78] sm:$0xff] }
  0x12   :  { %93 = vrot.lane.b32.xlu1 %v54_v6, %s247_s16  ;;  %91 = vrot.lane.b32.xlu0 %v53_v7, %s247_s16  ;;  %36 = vst.msk [vmem:[%s640_s3 + $0x28] sm:$0xff] %vm30_vm0, %v19_v37 }
  0x13   :  { %95 = vrot.lane.b32.xlu2 %v55_v8, %s247_s16  ;;  %38 = vst.msk [vmem:[%s640_s3 + $0x38] sm:$0xff] %vm30_vm0, %v21_v39 }
  0x14   :  { %37 = vst.msk [vmem:[%s640_s3 + $0x30] sm:$0xff] %vm30_vm0, %v20_v40 }
  0x15   :  { %39 = vst.msk [vmem:[%s640_s3 + $0x40] sm:$0xff] %vm30_vm0, %v22_v41 }
  0x16   :  { %41 = vst.msk [vmem:[%s640_s3 + $0x50] sm:$0xff] %vm30_vm0, %v24_v43 }
  0x17   :  { %40 = vst.msk [vmem:[%s640_s3 + $0x48] sm:$0xff] %vm30_vm0, %v23_v44 }
  0x18   :  { %42 = vst.msk [vmem:[%s640_s3 + $0x58] sm:$0xff] %vm30_vm0, %v25_v45 }
  0x19   :  { %44 = vst.msk [vmem:[%s640_s3 + $0x68] sm:$0xff] %vm30_vm0, %v27_v49 }
  0x1a   :  { %99 = vrot.lane.b32.xlu1 %v57_v9, %s247_s16  ;;  %97 = vrot.lane.b32.xlu0 %v56_v10, %s247_s16  ;;  %43 = vst.msk [vmem:[%s640_s3 + $0x60] sm:$0xff] %vm30_vm0, %v26_v50 }
  0x1b   :  { %101 = vrot.lane.b32.xlu2 %v58_v11, %s247_s16  ;;  %45 = vst.msk [vmem:[%s640_s3 + $0x70] sm:$0xff] %vm30_vm0, %v28_v52 }
  0x1c   :  { %46 = vst.msk [vmem:[%s640_s3 + $0x78] sm:$0xff] %vm30_vm0, %v29_v55 }
  0x22   :  { %105 = vrot.lane.b32.xlu1 %v60_v12, %s247_s16  ;;  %103 = vrot.lane.b32.xlu0 %v59_v13, %s247_s16 }
  0x23   :  { %107 = vrot.lane.b32.xlu2 %v61_v14, %s247_s16 }
  0x2a   :  { %176 = vrot.lane.b32.xlu1 %v144_v15, %s248_s21  ;;  %109 = vrot.lane.b32.xlu0 %v62_v16, %s247_s16 }
  0x2b   :  { %178 = vrot.lane.b32.xlu2 %v145_v17, %s248_s21 }
  0x32   :  { %182 = vrot.lane.b32.xlu1 %v147_v18, %s248_s21  ;;  %180 = vrot.lane.b32.xlu0 %v146_v19, %s248_s21 }
  0x33   :  { %184 = vrot.lane.b32.xlu2 %v148_v20, %s248_s21 }
  0x3a   :  { %188 = vrot.lane.b32.xlu1 %v150_v21, %s248_s21  ;;  %186 = vrot.lane.b32.xlu0 %v149_v22, %s248_s21 }
  0x3b   :  { %190 = vrot.lane.b32.xlu2 %v151_v23, %s248_s21 }
  0x42   :  { %194 = vrot.lane.b32.xlu1 %v153_v24, %s248_s21  ;;  %192 = vrot.lane.b32.xlu0 %v152_v25, %s248_s21 }
  0x43   :  { %196 = vrot.lane.b32.xlu2 %v154_v26, %s248_s21 }
  0x4a   :  { %200 = vrot.lane.b32.xlu1 %v156_v27, %s248_s21  ;;  %198 = vrot.lane.b32.xlu0 %v155_v28, %s248_s21 }
  0x4b   :  { %202 = vrot.lane.b32.xlu2 %v157_v29, %s248_s21 }
  0x52   :  { %206 = vrot.lane.b32.xlu1 %v159_v30, %s248_s21  ;;  %204 = vrot.lane.b32.xlu0 %v158_v31, %s248_s21 }
  0x5d   :  { %v88_v38 = vpop.permute.xlu2 %87 }
  0x5e   :  { %132 = vst.msk [vmem:[%s640_s3 + $0x20] sm:$0xff] %vm127_vm1, %v88_v38 }
  0x65   :  { %v90_v42 = vpop.permute.xlu2 %89 }
  0x66   :  { %133 = vst.msk [vmem:[%s640_s3 + $0x28] sm:$0xff] %vm127_vm1, %v90_v42 }
  0x6d   :  { %v96_v46 = vpop.permute.xlu2 %95 }
  0x6e   :  { %136 = vst.msk [vmem:[%s640_s3 + $0x40] sm:$0xff] %vm127_vm1, %v96_v46 }
  0x74   :  { %v84_v47 = vpop.permute.xlu1 %83  ;;  %v80_v48 = vpop.permute.xlu0 %79 }
  0x75   :  { %130 = vst.msk [vmem:[%s640_s3 + $0x10] sm:$0xff] %vm127_vm1, %v84_v47  ;;  %v102_v51 = vpop.permute.xlu2 %101 }
  0x76   :  { %128 = vst.msk [vmem:[%s640_s3] sm:$0xff] %vm127_vm1, %v80_v48 }
  0x77   :  { %139 = vst.msk [vmem:[%s640_s3 + $0x58] sm:$0xff] %vm127_vm1, %v102_v51 }
  0x7c   :  { %v86_v53 = vpop.permute.xlu1 %85  ;;  %v82_v54 = vpop.permute.xlu0 %81 }
  0x7d   :  { %131 = vst.msk [vmem:[%s640_s3 + $0x18] sm:$0xff] %vm127_vm1, %v86_v53  ;;  %v108_v56 = vpop.permute.xlu2 %107 }
  0x7e   :  { %129 = vst.msk [vmem:[%s640_s3 + $0x8] sm:$0xff] %vm127_vm1, %v82_v54 }
  0x7f   :  { %142 = vst.msk [vmem:[%s640_s3 + $0x70] sm:$0xff] %vm127_vm1, %v108_v56 }
  0x84   :  { %v94_v57 = vpop.permute.xlu1 %93  ;;  %v92_v58 = vpop.permute.xlu0 %91 }
  0x85   :  { %135 = vst.msk [vmem:[%s640_s3 + $0x38] sm:$0xff] %vm127_vm1, %v94_v57  ;;  %v179_v59 = vpop.permute.xlu2 %178 }
  0x86   :  { %134 = vst.msk [vmem:[%s640_s3 + $0x30] sm:$0xff] %vm127_vm1, %v92_v58 }
  0x87   :  { %226 = vst.msk [vmem:[%s640_s3 + $0x8] sm:$0xff] %vm224_vm2, %v179_v59 }
  0x8c   :  { %v100_v60 = vpop.permute.xlu1 %99  ;;  %v98_v61 = vpop.permute.xlu0 %97 }
  0x8d   :  { %138 = vst.msk [vmem:[%s640_s3 + $0x50] sm:$0xff] %vm127_vm1, %v100_v60  ;;  %v185_v62 = vpop.permute.xlu2 %184 }
  0x8e   :  { %137 = vst.msk [vmem:[%s640_s3 + $0x48] sm:$0xff] %vm127_vm1, %v98_v61 }
  0x8f   :  { %229 = vst.msk [vmem:[%s640_s3 + $0x20] sm:$0xff] %vm224_vm2, %v185_v62 }
  0x94   :  { %v106_v63 = vpop.permute.xlu1 %105  ;;  %v104_v0 = vpop.permute.xlu0 %103 }
  0x95   :  { %141 = vst.msk [vmem:[%s640_s3 + $0x68] sm:$0xff] %vm127_vm1, %v106_v63  ;;  %v191_v1 = vpop.permute.xlu2 %190 }
  0x96   :  { %140 = vst.msk [vmem:[%s640_s3 + $0x60] sm:$0xff] %vm127_vm1, %v104_v0 }
  0x97   :  { %232 = vst.msk [vmem:[%s640_s3 + $0x38] sm:$0xff] %vm224_vm2, %v191_v1 }
  0x9c   :  { %v177_v2 = vpop.permute.xlu1 %176  ;;  %v110_v3 = vpop.permute.xlu0 %109 }
  0x9d   :  { %225 = vst.msk [vmem:[%s640_s3] sm:$0xff] %vm224_vm2, %v177_v2  ;;  %v197_v4 = vpop.permute.xlu2 %196 }
  0x9e   :  { %143 = vst.msk [vmem:[%s640_s3 + $0x78] sm:$0xff] %vm127_vm1, %v110_v3 }
  0x9f   :  { %235 = vst.msk [vmem:[%s640_s3 + $0x50] sm:$0xff] %vm224_vm2, %v197_v4 }
  0xa4   :  { %v183_v5 = vpop.permute.xlu1 %182  ;;  %v181_v6 = vpop.permute.xlu0 %180 }
  0xa5   :  { %228 = vst.msk [vmem:[%s640_s3 + $0x18] sm:$0xff] %vm224_vm2, %v183_v5  ;;  %v203_v7 = vpop.permute.xlu2 %202 }
  0xa6   :  { %227 = vst.msk [vmem:[%s640_s3 + $0x10] sm:$0xff] %vm224_vm2, %v181_v6 }
  0xa7   :  { %238 = vst.msk [vmem:[%s640_s3 + $0x68] sm:$0xff] %vm224_vm2, %v203_v7 }
  0xac   :  { %v189_v8 = vpop.permute.xlu1 %188  ;;  %v187_v9 = vpop.permute.xlu0 %186 }
  0xad   :  { %231 = vst.msk [vmem:[%s640_s3 + $0x30] sm:$0xff] %vm224_vm2, %v189_v8 }
  0xae   :  { %230 = vst.msk [vmem:[%s640_s3 + $0x28] sm:$0xff] %vm224_vm2, %v187_v9 }
  0xb4   :  { %v195_v10 = vpop.permute.xlu1 %194  ;;  %v193_v11 = vpop.permute.xlu0 %192 }
  0xb5   :  { %234 = vst.msk [vmem:[%s640_s3 + $0x48] sm:$0xff] %vm224_vm2, %v195_v10 }
  0xb6   :  { %233 = vst.msk [vmem:[%s640_s3 + $0x40] sm:$0xff] %vm224_vm2, %v193_v11 }
  0xbc   :  { %v201_v12 = vpop.permute.xlu1 %200  ;;  %v199_v13 = vpop.permute.xlu0 %198 }
  0xbd   :  { %237 = vst.msk [vmem:[%s640_s3 + $0x60] sm:$0xff] %vm224_vm2, %v201_v12 }
  0xbe   :  { %236 = vst.msk [vmem:[%s640_s3 + $0x58] sm:$0xff] %vm224_vm2, %v199_v13 }
  0xc4   :  { %v207_v14 = vpop.permute.xlu1 %206  ;;  %v205_v15 = vpop.permute.xlu0 %204 }
  0xc5   :  { %240 = vst.msk [vmem:[%s640_s3 + $0x78] sm:$0xff] %vm224_vm2, %v207_v14 }
  0xc6   :  { %239 = vst.msk [vmem:[%s640_s3 + $0x70] sm:$0xff] %vm224_vm2, %v205_v15 }

</bundles_post_ra>
